<compile_context>
chip_gen: v6e
topology: v6e:2x2x1
jax: 0.10.0
libtpu: 0.0.40
codegen_flags: <defaults>
</compile_context>

<pallas_src>
import functools

import jax
import jax.numpy as jnp
from jax import lax
from jax.experimental import pallas as pl
from jax.experimental.pallas import tpu as pltpu

_NEG_INF = float(jnp.finfo(jnp.float32).min)  # finite mask/init value (avoids inf-inf NaNs)


# ------------------------------ tiling helpers ------------------------------ #

def _sublane_align(dtype):
    # sub-32-bit dtypes pack rows along sublanes: f32 -> 8, bf16 -> 16, int8/fp8 -> 32
    return max(8, 32 // jnp.dtype(dtype).itemsize)


def _pick_tile(dim, cap, align):
    """Returns (tile, ragged). Largest `align`-multiple divisor of `dim` <= cap,
    else the full dim (ragged=False), else the capped align-multiple tile with a
    ragged last block (ragged=True)."""
    if dim <= cap:
        return dim, False
    t = (cap // align) * align
    tt = t
    while tt >= align:
        if dim % tt == 0:
            return tt, False
        tt -= align
    return t, True


# ----------------------------- projection kernel ---------------------------- #

def _linear_kernel(x_ref, w_ref, o_ref):
    o_ref[...] = jnp.dot(x_ref[...], w_ref[...],
                         preferred_element_type=jnp.float32).astype(o_ref.dtype)


def pallas_linear(x2d, w, *, tm_cap=512, tn_cap=512):
    """x2d: (M, K) @ w: (K, N) (already transposed vs. torch Linear).
    K is kept un-tiled (these layers have K <= ~2048), so there is no
    accumulator scratch and no reduction grid axis."""
    M, K = x2d.shape
    N = w.shape[1]
    tm, _ = _pick_tile(M, tm_cap, _sublane_align(x2d.dtype))
    tn, _ = _pick_tile(N, tn_cap, 128)
    grid = (pl.cdiv(M, tm), pl.cdiv(N, tn))

    itemsize = jnp.dtype(x2d.dtype).itemsize
    cost = pl.CostEstimate(
        flops=2 * M * N * K,
        transcendentals=0,
        bytes_accessed=(M * K + K * N + M * N) * itemsize,
    )

    return pl.pallas_call(
        _linear_kernel,
        out_shape=jax.ShapeDtypeStruct((M, N), x2d.dtype),
        grid=grid,
        in_specs=[
            pl.BlockSpec((tm, K), lambda i, j: (i, 0)),
            pl.BlockSpec((K, tn), lambda i, j: (0, j)),
        ],
        out_specs=pl.BlockSpec((tm, tn), lambda i, j: (i, j)),
        compiler_params=pltpu.CompilerParams(
            dimension_semantics=("parallel", "parallel")),
        cost_estimate=cost,
    )(x2d, w)


# -------------------------- flash attention kernel -------------------------- #

def _flash_attn_kernel(q_ref, kv_ref, wo_ref, bo_ref, o_ref,
                       acc_ref, m_ref, l_ref,
                       *, heads, dim_head, kv_len, mask_kv, exp_dtype):
    # q_ref:  (1, tq, H*d)       softmax scale already folded into w_q
    # kv_ref: (1, tk, 2*H*d)     per-head column groups [K_0|V_0|K_1|V_1|...]
    # wo_ref: (H*d, query_dim)   VMEM-resident output-projection weights
    # bo_ref: (1, query_dim)     VMEM-resident output-projection bias
    # o_ref:  (1, tq, query_dim)
    # acc_ref: (H, tq, d) f32 head-major accumulator (whole-buffer stores)
    # m_ref / l_ref: (H, tq, 1) f32 running max / running sum
    ki = pl.program_id(2)

    @pl.when(ki == 0)
    def _init():
        m_ref[...] = jnp.full_like(m_ref, _NEG_INF)
        l_ref[...] = jnp.zeros_like(l_ref)
        acc_ref[...] = jnp.zeros_like(acc_ref)

    q = q_ref[0]                   # (tq, H*d), input dtype
    kv = kv_ref[0]                 # (tk, 2*H*d)
    tk = kv.shape[0]

    if mask_kv:
        # Ragged KV tail: zero the garbage K/V rows once per KV tile (keeps the
        # P@V matmul finite) and build an additive score bias outside the head loop.
        row = ki * tk + lax.broadcasted_iota(jnp.int32, (tk, 1), 0)
        kv = jnp.where(row < kv_len, kv, jnp.zeros_like(kv))
        col = ki * tk + lax.broadcasted_iota(jnp.int32, (1, tk), 1)
        bias = jnp.where(col < kv_len, 0.0, _NEG_INF)

    for h in range(heads):         # static unrolled loop; heads stay on-chip
        base = 2 * h * dim_head
        qh = q[:, h * dim_head:(h + 1) * dim_head]          # (tq, d)
        kh = kv[:, base:base + dim_head]                     # (tk, d), vreg-aligned start
        vh = kv[:, base + dim_head:base + 2 * dim_head]      # (tk, d)

        # sim = q @ k^T with fp32 accumulation, no explicit transpose of k.
        s = lax.dot_general(qh, kh, (((1,), (1,)), ((), ())),
                            preferred_element_type=jnp.float32)         # (tq, tk)
        if mask_kv:
            s = s + bias

        m_prev = m_ref[h]                                                # (tq, 1)
        m_new = jnp.maximum(m_prev, s.max(axis=-1, keepdims=True))
        alpha = jnp.exp(m_prev - m_new)                                  # (tq, 1) f32
        # bf16 exp only for bf16 activations (EUP is the binding slot on v6e/v7x);
        # fp32 activations (and v5e) keep fp32 exp.
        p = jnp.exp((s - m_new).astype(exp_dtype))                       # (tq, tk)
        l_ref[h] = alpha * l_ref[h] + p.sum(axis=-1, keepdims=True,
                                            dtype=jnp.float32)
        pv = lax.dot_general(p.astype(vh.dtype), vh, (((1,), (0,)), ((), ())),
                             preferred_element_type=jnp.float32)         # (tq, d)
        acc_ref[h] = alpha * acc_ref[h] + pv                             # whole-buffer store
        m_ref[h] = m_new

    @pl.when(ki == pl.num_programs(2) - 1)
    def _fin():
        # Fused epilogue: normalize and apply to_out (Linear + bias) in-kernel.
        qd = wo_ref.shape[1]
        tq = acc_ref.shape[1]
        acc_out = jnp.zeros((tq, qd), jnp.float32)
        for h in range(heads):
            inv_l = pl.reciprocal(l_ref[h], approx=True)                 # EUP, ~free
            nh = (acc_ref[h] * inv_l).astype(wo_ref.dtype)               # (tq, d)
            acc_out = acc_out + lax.dot_general(
                nh, wo_ref[h * dim_head:(h + 1) * dim_head, :],
                (((1,), (0,)), ((), ())), preferred_element_type=jnp.float32)
        o_ref[0] = (acc_out + bo_ref[...].astype(jnp.float32)).astype(o_ref.dtype)


def flash_cross_attention(q3, kv3, w_out, b_out2d, *, heads, dim_head,
                          tq_cap=512, tk_cap=1024):
    """q3: (B, N, H*d); kv3: (B, M, 2*H*d) with per-head [K_h|V_h] column groups.
    w_out: (H*d, query_dim); b_out2d: (1, query_dim). Returns (B, N, query_dim)."""
    B, N, inner = q3.shape
    M = kv3.shape[1]
    qd = w_out.shape[1]
    assert inner == heads * dim_head and kv3.shape[2] == 2 * inner

    sub = _sublane_align(q3.dtype)
    tq, _ = _pick_tile(N, tq_cap, sub)        # ragged q blocks: OOB rows are discarded
    tk, mask_kv = _pick_tile(M, tk_cap, sub)  # ragged kv blocks handled in-kernel
    # v7x has 2 TensorCores: make sure the parallel (B, n_q) axes expose >= 2 tiles.
    if B == 1 and tq == N and N % (2 * sub) == 0:
        tq = N // 2
    n_q = pl.cdiv(N, tq)
    n_k = pl.cdiv(M, tk)

    exp_dtype = jnp.bfloat16 if q3.dtype == jnp.bfloat16 else jnp.float32

    kernel = functools.partial(
        _flash_attn_kernel, heads=heads, dim_head=dim_head,
        kv_len=M, mask_kv=mask_kv, exp_dtype=exp_dtype)

    itemsize = jnp.dtype(q3.dtype).itemsize
    cost = pl.CostEstimate(
        flops=4 * B * N * M * inner + 2 * B * N * inner * qd,
        transcendentals=B * heads * N * M,
        bytes_accessed=(q3.size + n_q * kv3.size + B * N * qd) * itemsize
                       + w_out.size * jnp.dtype(w_out.dtype).itemsize,
    )

    return pl.pallas_call(
        kernel,
        out_shape=jax.ShapeDtypeStruct((B, N, qd), q3.dtype),
        grid=(B, n_q, n_k),
        in_specs=[
            pl.BlockSpec((1, tq, inner), lambda b, qi, ki: (b, qi, 0)),
            pl.BlockSpec((1, tk, 2 * inner), lambda b, qi, ki: (b, ki, 0)),
            pl.BlockSpec((inner, qd), lambda b, qi, ki: (0, 0)),   # resident weights
            pl.BlockSpec((1, qd), lambda b, qi, ki: (0, 0)),       # resident bias
        ],
        out_specs=pl.BlockSpec((1, tq, qd), lambda b, qi, ki: (b, qi, 0)),
        scratch_shapes=[
            pltpu.VMEM((heads, tq, dim_head), jnp.float32),  # head-major output accumulator
            pltpu.VMEM((heads, tq, 1), jnp.float32),         # running max
            pltpu.VMEM((heads, tq, 1), jnp.float32),         # running sum
        ],
        compiler_params=pltpu.CompilerParams(
            dimension_semantics=("parallel", "parallel", "arbitrary"),
            vmem_limit_bytes=48 * 1024 * 1024,   # leave headroom on v7x (64 MiB physical)
        ),
        cost_estimate=cost,
    )(q3, kv3, w_out, b_out2d)


# ------------------------------ module wrapper ------------------------------ #

def init_cross_attention_params(key, query_dim, context_dim=None, heads=8, dim_head=64):
    context_dim = context_dim or query_dim
    inner_dim = heads * dim_head
    k1, k2, k3, k4, k5 = jax.random.split(key, 5)
    scale = 0.02
    return {
        # stored already transposed: (in_features, out_features)
        "w_q": scale * jax.random.normal(k1, (query_dim, inner_dim), jnp.float32),
        "w_k": scale * jax.random.normal(k2, (context_dim, inner_dim), jnp.float32),
        "w_v": scale * jax.random.normal(k3, (context_dim, inner_dim), jnp.float32),
        "w_out": scale * jax.random.normal(k4, (inner_dim, query_dim), jnp.float32),
        "b_out": scale * jax.random.normal(k5, (query_dim,), jnp.float32),
    }


def cross_attention_forward(x, params, context=None, heads=8):
    B, N, _ = x.shape
    ctx = x if context is None else context
    M, ctx_dim = ctx.shape[1], ctx.shape[2]
    inner = params["w_q"].shape[1]
    d = inner // heads
    scale = d ** (-0.5)

    # Fold the softmax scale into the fp32 q weights (free; removes the per-KV-step
    # rescale of the resident q tile and keeps the scaling at fp32 precision).
    w_q = params["w_q"] * scale

    # Fused K|V projection with per-head [K_h | V_h] column grouping so in-kernel
    # K/V slices start on 128-lane boundaries (context is read from HBM once).
    w_kv = jnp.concatenate(
        [params["w_k"].reshape(ctx_dim, heads, d),
         params["w_v"].reshape(ctx_dim, heads, d)], axis=-1,
    ).reshape(ctx_dim, 2 * inner)

    q = pallas_linear(x.reshape(B * N, -1), w_q).reshape(B, N, inner)
    kv = pallas_linear(ctx.reshape(B * M, -1), w_kv).reshape(B, M, 2 * inner)

    # Flash attention with the to_out projection (+ bias) fused into the finalize.
    # Dropout(p) in eval mode is identity.
    out = flash_cross_attention(q, kv, params["w_out"], params["b_out"].reshape(1, -1),
                                heads=heads, dim_head=d)
    return out


# ------------------------------ pure-JAX reference --------------------------- #

def _ref_forward(x, ctx, params, heads):
    q = x @ params["w_q"]
    k = ctx @ params["w_k"]
    v = ctx @ params["w_v"]
    B, N, inner = q.shape
    M = ctx.shape[1]
    d = inner // heads
    qh = q.reshape(B, N, heads, d).transpose(0, 2, 1, 3)
    kh = k.reshape(B, M, heads, d).transpose(0, 2, 1, 3)
    vh = v.reshape(B, M, heads, d).transpose(0, 2, 1, 3)
    sim = jnp.einsum("bhid,bhjd->bhij",
                     qh.astype(jnp.float32), kh.astype(jnp.float32)) * (d ** (-0.5))
    p = jax.nn.softmax(sim, axis=-1)
    o = jnp.einsum("bhij,bhjd->bhid", p, vh.astype(jnp.float32))
    o = o.transpose(0, 2, 1, 3).reshape(B, N, inner).astype(x.dtype)
    return o @ params["w_out"] + params["b_out"]


if __name__ == "__main__":
    B, N, M = 2, 16, 8
    query_dim, context_dim = 32, 16
    heads, dim_head = 4, 8

    key = jax.random.PRNGKey(0)
    kx, kc, kp = jax.random.split(key, 3)
    x = jax.random.normal(kx, (B, N, query_dim), jnp.float32)
    context = jax.random.normal(kc, (B, M, context_dim), jnp.float32)
    params = init_cross_attention_params(kp, query_dim, context_dim, heads, dim_head)

    # cross-attention path
    out = cross_attention_forward(x, params, context=context, heads=heads)
    out = jax.block_until_ready(out)
    ref = _ref_forward(x, context, params, heads)
    assert out.shape == (B, N, query_dim)
    assert jnp.allclose(out, ref, atol=1e-3, rtol=1e-3), "cross-attn mismatch vs reference"

    # self-attention path (context=None) -- only valid when context_dim == query_dim
    params_self = init_cross_attention_params(
        jax.random.PRNGKey(1), query_dim, None, heads, dim_head)
    out_self = cross_attention_forward(x, params_self, context=None, heads=heads)
    out_self = jax.block_until_ready(out_self)
    ref_self = _ref_forward(x, x, params_self, heads)
    assert jnp.allclose(out_self, ref_self, atol=1e-3, rtol=1e-3), "self-attn mismatch vs reference"

    print("KERNEL_OK")
</pallas_src>

<mosaic_0001>
module attributes {stable_mosaic.version = 11 : i64} {
  func.func @_linear_kernel(%arg0: i32, %arg1: i32, %arg2: memref<32x32xf32, #tpu.memory_space<vmem>>, %arg3: memref<32x32xf32, #tpu.memory_space<vmem>>, %arg4: memref<32x32xf32, #tpu.memory_space<vmem>>) attributes {dimension_semantics = [#tpu.dimension_semantics<parallel>, #tpu.dimension_semantics<parallel>], iteration_bounds = array<i64: 1, 1>, scalar_prefetch = 0 : i64, scratch_operands = 0 : i64, tpu.core_type = #tpu.core_type<tc>, window_params = [{transform_indices = @transform_0, window_bounds = array<i64: 32, 32>}, {transform_indices = @transform_1, window_bounds = array<i64: 32, 32>}, {transform_indices = @transform_2, window_bounds = array<i64: 32, 32>}]} {
    %c0 = arith.constant 0 : index
    %c0_0 = arith.constant 0 : index
    %0 = vector.load %arg2[%c0, %c0_0] : memref<32x32xf32, #tpu.memory_space<vmem>>, vector<32x32xf32>
    %c0_1 = arith.constant 0 : index
    %c0_2 = arith.constant 0 : index
    %1 = vector.load %arg3[%c0_1, %c0_2] : memref<32x32xf32, #tpu.memory_space<vmem>>, vector<32x32xf32>
    %cst = arith.constant dense<0.000000e+00> : vector<32x32xf32>
    %2 = tpu.matmul %0, %1, %cst {dimension_numbers = #tpu.dot_dimension_numbers<[1], [0], [0], [1], [0, 0, 1, 1], [], []>} : vector<32x32xf32>, vector<32x32xf32>, vector<32x32xf32> -> vector<32x32xf32>
    %c0_3 = arith.constant 0 : index
    %c0_4 = arith.constant 0 : index
    %3 = vector.load %arg4[%c0_3, %c0_4] : memref<32x32xf32, #tpu.memory_space<vmem>>, vector<32x32xf32>
    tpu.vector_store %arg4[%c0_3, %c0_4], %2 {strides = array<i32>} : memref<32x32xf32, #tpu.memory_space<vmem>>, vector<32x32xf32>,
    return
  }
  func.func @transform_0(%arg0: i32, %arg1: i32) -> (i32, i32) {
    %c0_i32 = arith.constant 0 : i32
    %c0_i32_0 = arith.constant 0 : i32
    return %arg0, %c0_i32 : i32, i32
  }
  func.func @transform_1(%arg0: i32, %arg1: i32) -> (i32, i32) {
    %c0_i32 = arith.constant 0 : i32
    %c0_i32_0 = arith.constant 0 : i32
    return %c0_i32, %arg1 : i32, i32
  }
  func.func @transform_2(%arg0: i32, %arg1: i32) -> (i32, i32) {
    %c0_i32 = arith.constant 0 : i32
    return %arg0, %arg1 : i32, i32
  }
}

</mosaic_0001>

<bundles_post_ra>
// kernel: tpu_custom_call.1
= control target key start
LH: loop header
LB: loop body
LE: loop exit
PB: predicated region body
PF: predicated region fallthrough
CT: control target
= control target key end

     0   :  { %7 = vsyncpa [#allocation3], 0  ;;  %s319_s0 = inlined_call_operand.hbm [shape: f32[32,32], index: 0, kind: input, shape index: {}]   ;;  %s320_s1 = inlined_call_operand.hbm [shape: f32[32,32], index: 1, kind: input, shape index: {}]   ;;  %s321_s2 = inlined_call_operand.hbm [shape: f32[32,32], index: 2, kind: output, shape index: {}]  }
   0x1   :  { %8 = vsyncpa [#allocation6], 0 }
   0x2   :  { %9 = vsyncpa [#allocation4], 0  ;;  %s273_s9 = smov [#allocation2]  }
   0x3   :  { %s15_s10 = sshll.u32 %s273_s9, 4  ;;  %s16_s10 = int_to_ptr.vmem [resolvable:$true] %s15_s10 }
   0x4   :  { %s215_s11 = scalar_lea.vmem %s16_s10, 512  ;;  %p220_p1 = scmp.lt.s32.totalorder %s16_s10, %s16_s10 }
   0x5   :  { %p216_p0 = scmp.ne.s32.totalorder %s16_s10, %s215_s11  ;;  %p221_p2 = scmp.lt.s32.totalorder %s215_s11, %s215_s11 }
   0x7   :  { %p222_p3 = por %p221_p2, %p220_p1 }
   0x9   :  { %p223_p4 = pnand %p222_p3, %p216_p0 }
   0xb   :  { %226 = shalt.err (!%p223_p4)
}
   0xc   :  { %s274_s12 = smov 128   ;;  %s275_s13 = smov 8  }
   0xd   :  { %21 = dma.hbm_to_vmem [thread:$0]  %s319_s0, 512, %s16_s10, [#allocation3], %s274_s12, %s274_s12, %s275_s13  }
   0xe   :  { %s276_s16 = smov [#allocation5]  }
   0xf   :  { %s27_s17 = sshll.u32 %s276_s16, 4  ;;  %s28_s17 = int_to_ptr.vmem [resolvable:$true] %s27_s17 }
  0x10   :  { %s235_s18 = scalar_lea.vmem %s28_s17, 512  ;;  %p240_p6 = scmp.lt.s32.totalorder %s28_s17, %s28_s17 }
  0x11   :  { %p236_p5 = scmp.ne.s32.totalorder %s28_s17, %s235_s18  ;;  %p241_p7 = scmp.lt.s32.totalorder %s235_s18, %s235_s18 }
  0x13   :  { %p242_p8 = por %p241_p7, %p240_p6 }
  0x15   :  { %p243_p9 = pnand %p242_p8, %p236_p5 }
  0x17   :  { %246 = shalt.err (!%p243_p9)
}
  0x18   :  { %33 = dma.hbm_to_vmem [thread:$0]  %s320_s1, 512, %s28_s17, [#allocation6], %s274_s12, %s274_s12, %s275_s13  }
  0x19   :  { %267 = dma.done.wait [#allocation3], 512  }
  0x1a   :  { %268 = vsyncadd [#allocation3], 4294966784 }
  0x1b   :  { %269 = dma.done.wait [#allocation6], 512  }
  0x1c   :  { %270 = vsyncadd [#allocation6], 4294966784  ;;  %v47_v0 = vld [vmem:[#allocation5 + $0x18] sm:$0xff]  ;;  %v46_v1 = vld [vmem:[#allocation5 + $0x10] sm:$0xff]  ;;  %vm48_vm0 = vcmask 261120   ;;  %s277_s0 = smov [#allocation7]  }
  0x1d   :  { %180 = vmatprep.subr.mxu0 %v47_v0  ;;  %194 = vmatprep.subr.mxu1 %v47_v0  ;;  %v45_v2 = vld [vmem:[#allocation5 + $0x8] sm:$0xff]  ;;  %v44_v3 = vld [vmem:[#allocation5] sm:$0xff]  ;;  %v42_v5 = vld [vmem:[#allocation2 + $0x10] sm:$0xff]  ;;  %s155_s1 = sshll.u32 %s277_s0, 4  ;;  %s156_s1 = int_to_ptr.vmem [resolvable:$true] %s155_s1 }
  0x1e   :  { %181 = vmatpush3.msra.mxu0 %v47_v0  ;;  %198 = vmatpush3.msra.mxu1 %v47_v0  ;;  %v40_v4 = vld [vmem:[#allocation2] sm:$0xff]  ;;  %v41_v6 = vld [vmem:[#allocation2 + $0x8] sm:$0xff]  ;;  %v43_v7 = vld [vmem:[#allocation2 + $0x18] sm:$0xff]  ;;  %s247_s21 = scalar_lea.vmem %s156_s1, 512  ;;  %p252_p11 = scmp.lt.s32.totalorder %s156_s1, %s156_s1 }
  0x1f   :  { %182 = vmatprep.subr.mxu0 %v46_v1  ;;  %195 = vmatprep.subr.mxu1 %v46_v1  ;;  %p248_p10 = scmp.ne.s32.totalorder %s156_s1, %s247_s21  ;;  %p253_p12 = scmp.lt.s32.totalorder %s247_s21, %s247_s21 }
  0x20   :  { %183 = vmatpush3.msra.mxu0 %v46_v1  ;;  %199 = vmatpush3.msra.mxu1 %v46_v1 }
  0x21   :  { %184 = vmatprep.subr.mxu0 %v45_v2  ;;  %196 = vmatprep.subr.mxu1 %v45_v2  ;;  %p254_p13 = por %p253_p12, %p252_p11 }
  0x22   :  { %185 = vmatpush3.msra.mxu0 %v45_v2  ;;  %200 = vmatpush3.msra.mxu1 %v45_v2 }
  0x23   :  { %186 = vmatprep.subr.mxu0 %v44_v3  ;;  %197 = vmatprep.subr.mxu1 %v44_v3  ;;  %p255_p0 = pnand %p254_p13, %p248_p10 }
  0x24   :  { %187 = vmatpush3.msra.mxu0 %v44_v3  ;;  %201 = vmatpush3.msra.mxu1 %v44_v3 }
  0x25   :  { %188 = vmatprep.mubr.msk.f32.mxu0 %vm48_vm0, %v40_v4  ;;  %191 = vmatprep.mubr.msk.f32.mxu1 %vm48_vm0, %v42_v5 }
  0x26   :  { %189 = vmatmul.mubr.msk.f32.vlgmr.msra.gmra.mxu0 %vm48_vm0, %v41_v6  ;;  %192 = vmatmul.mubr.msk.f32.vlgmr.msra.gmra.mxu1 %vm48_vm0, %v43_v7 }
  0xe6   :  { %v190_v8 = vpop.f32.mrf.mxu0  ;;  %v193_v9 = vpop.f32.mrf.mxu1 }
  0xe7   :  { %147 = vst.msk [vmem:[#allocation7 + $0x8] sm:$0xff] %vm48_vm0, %v190_v8  ;;  %149 = vst.msk [vmem:[#allocation7 + $0x18] sm:$0xff] %vm48_vm0, %v193_v9 }
  0xe8   :  { %v127_v10 = vpop.f32.mrf.mxu0  ;;  %v137_v11 = vpop.f32.mrf.mxu1 }
  0xe9   :  { %146 = vst.msk [vmem:[#allocation7] sm:$0xff] %vm48_vm0, %v127_v10  ;;  %148 = vst.msk [vmem:[#allocation7 + $0x10] sm:$0xff] %vm48_vm0, %v137_v11 }
  0xea   :  { %258 = shalt.err (!%p255_p0)
}
  0xeb   :  { %161 = dma.vmem_to_hbm [thread:$0]  %s156_s1, 512, %s321_s2, [#allocation4], %s274_s12, %s274_s12, %s275_s13  }
  0xec   :  { %271 = dma.done.wait [#allocation4], 512  }
  0xed   :  { %272 = vsyncadd [#allocation4], 4294966784 }
  0xee   :  { %165 = vsyncpa [#allocation3], 1 }
  0xef   :  { %166 = vsyncpa [#allocation6], 1 }
  0xf0   :  { %167 = vsyncpa [#allocation4], 1 }

</bundles_post_ra>
